<compile_context>
chip_gen: v6e
topology: v6e:2x2x1
jax: 0.10.0
libtpu: 0.0.40
codegen_flags: <defaults>
</compile_context>

<pallas_src>
import jax
import jax.numpy as jnp
from jax import lax
from jax.experimental import pallas as pl
from jax.experimental.pallas import tpu as pltpu

# ---- configuration (stand-ins for `config.*`) -------------------------------
FEATURE_WINDOW = 4          # config.FEATURE_WINDOW  (W)
HID_DIM        = 32         # config.HID_DIM
GAT_HEADS      = 2          # config.GAT_HEADS
OUT_DIM        = 2
NUM_FEATS      = 4          # in_dim // W
IN_DIM         = NUM_FEATS * FEATURE_WINDOW      # 16
CONV_OUT       = 16
FEAT0          = CONV_OUT * FEATURE_WINDOW       # 16 * W = 64
N_NODES        = 16
BN_EPS         = 1e-5
LEAKY_SLOPE    = 0.2        # GATConv default negative_slope


def _row_bcast(col):
    """(N,1) column -> (N,N) matrix M[i,j] = col[j,0]  (transpose-free, via MXU)."""
    return lax.dot_general(
        jnp.ones_like(col), col,
        (((1,), (1,)), ((), ())),
        preferred_element_type=jnp.float32,
    )


def temporal_gat_kernel(
    x_ref, adj_ref,
    wconv_ref, bconv_ref,
    g1w_ref, g1sb_ref,
    bn1s_ref, bn1b_ref,
    g2w_ref, g2b_ref,
    out_ref,
):
    adj = adj_ref[...]                       # (N, N); adj[i, j]=1 iff edge j -> i (incl. self loops)
    n = adj.shape[0]

    # ---- temporal Conv1d(k=3, pad=1) pre-folded to a single matmul + ReLU ----
    h = jnp.dot(x_ref[...], wconv_ref[...], preferred_element_type=jnp.float32)
    h = jnp.maximum(h + bconv_ref[...], 0.0)                     # (N, 16*W), channel-major

    # ---- GAT layer 1 (BN0 + attention-score columns folded into g1w) --------
    # sfull = [ head0 feats | head1 feats | a_src0 a_dst0 a_src1 a_dst1 ]
    sfull = jnp.dot(h, g1w_ref[...], preferred_element_type=jnp.float32) + g1sb_ref[...]
    score0 = GAT_HEADS * HID_DIM
    heads = []
    for hd in range(GAT_HEADS):
        s_h = sfull[:, hd * HID_DIM:(hd + 1) * HID_DIM]          # (N, HID)
        a_src = sfull[:, score0 + 2 * hd:score0 + 2 * hd + 1]    # (N, 1)
        a_dst = sfull[:, score0 + 2 * hd + 1:score0 + 2 * hd + 2]
        e = a_dst + _row_bcast(a_src)                            # e[i,j] = a_dst[i] + a_src[j]
        e = jnp.where(e > 0, e, LEAKY_SLOPE * e)                 # leaky relu
        e = e - jnp.max(e, axis=1, keepdims=True)                # numerical shift (cancels below)
        p = jnp.exp(e) * adj                                     # adj zeroes non-edges
        alpha = p * pl.reciprocal(jnp.sum(p, axis=1, keepdims=True), approx=True)
        heads.append(jnp.dot(alpha, s_h, preferred_element_type=jnp.float32))
    h1 = jnp.concatenate(heads, axis=1)                          # (N, HEADS*HID)

    # ---- BN1 (eval; GAT1 bias folded into shift) + ELU -----------------------
    h1 = h1 * bn1s_ref[...] + bn1b_ref[...]
    h1 = jnp.where(h1 > 0, h1, jnp.exp(jnp.minimum(h1, 0.0)) - 1.0)

    # ---- GAT layer 2 (single head, concat=False); att columns in g2w ---------
    s2full = jnp.dot(h1, g2w_ref[...], preferred_element_type=jnp.float32)   # (N, OUT+2)
    s2 = s2full[:, :OUT_DIM]
    a2_src = s2full[:, OUT_DIM:OUT_DIM + 1]
    a2_dst = s2full[:, OUT_DIM + 1:OUT_DIM + 2]
    e2 = a2_dst + _row_bcast(a2_src)
    e2 = jnp.where(e2 > 0, e2, LEAKY_SLOPE * e2)
    e2 = e2 - jnp.max(e2, axis=1, keepdims=True)
    p2 = jnp.exp(e2) * adj
    alpha2 = p2 * pl.reciprocal(jnp.sum(p2, axis=1, keepdims=True), approx=True)
    out2 = jnp.dot(alpha2, s2, preferred_element_type=jnp.float32) + g2b_ref[...]

    # ---- lane-dense packed output: att2 in lanes [0,N), logits in [N,N+OUT) --
    pad = out_ref.shape[1] - n - OUT_DIM
    pieces = [alpha2, out2]
    if pad > 0:
        pieces.append(jnp.zeros((n, pad), jnp.float32))
    out_ref[...] = jnp.concatenate(pieces, axis=1)               # single unmasked full-width store


# ------------------------------------------------------------------------------
# One-time (per set of weights / per graph) precompute — hoisted off the
# per-call path as recommended by the perf review.
# ------------------------------------------------------------------------------
def prepare_params(params):
    W, C = FEATURE_WINDOW, NUM_FEATS
    f32 = jnp.float32

    # Conv1d(k=3, pad=1) folded to a direct (C*W, CONV_OUT*W) matmul on the raw
    # (N, C*W) input. Output columns are channel-major (o*W + t), matching
    # x.view(N, -1) of the NCW conv output in the reference module.
    conv_w = params['conv_w']                                    # (O, C, 3)
    t_in = jnp.arange(W)
    t_out = jnp.arange(W)
    k = t_in[:, None] - t_out[None, :] + 1                       # kernel tap index
    valid = ((k >= 0) & (k < 3)).astype(f32)
    kc = jnp.clip(k, 0, 2)
    g = conv_w[:, :, kc] * valid[None, None, :, :]               # (O, C, W_in, W_out)
    wconv = jnp.transpose(g, (1, 2, 0, 3)).reshape(C * W, CONV_OUT * W)
    bconv = jnp.repeat(params['conv_b'], W)[None, :]             # (1, O*W)

    # Fold eval-mode BatchNorm into per-feature scale / shift.
    def fold_bn(gam, bet, m, v):
        s = gam / jnp.sqrt(v + BN_EPS)
        return s, bet - m * s

    bn0s, bn0b = fold_bn(params['bn0_g'], params['bn0_b'], params['bn0_m'], params['bn0_v'])
    bn1s, bn1b = fold_bn(params['bn1_g'], params['bn1_b'], params['bn1_m'], params['bn1_v'])

    # GAT1: append block-diagonal attention-score columns (a_src/a_dst per head)
    # so scores come out of the same MXU matmul, then fold BN0 into the weight.
    HH = GAT_HEADS * HID_DIM
    watt = jnp.zeros((HH, 2 * GAT_HEADS), f32)
    for hd in range(GAT_HEADS):
        watt = watt.at[hd * HID_DIM:(hd + 1) * HID_DIM, 2 * hd].set(params['g1_asrc'][hd])
        watt = watt.at[hd * HID_DIM:(hd + 1) * HID_DIM, 2 * hd + 1].set(params['g1_adst'][hd])
    g1w_ext = jnp.concatenate([params['g1_w'], params['g1_w'] @ watt], axis=1)   # (FEAT0, HH+2H)
    g1w = bn0s[:, None] * g1w_ext
    g1sb = (bn0b @ g1w_ext)[None, :]

    # GAT1 bias is linear under BN1 -> fold it into the BN1 shift.
    bn1s_row = bn1s[None, :]
    bn1b_row = (params['g1_b'] * bn1s + bn1b)[None, :]

    # GAT2: append src/dst attention columns to the weight.
    g2w = jnp.concatenate(
        [params['g2_w'],
         params['g2_w'] @ params['g2_asrc'].T,
         params['g2_w'] @ params['g2_adst'].T], axis=1)          # (HH, OUT+2)
    g2b = params['g2_b'][None, :]

    return dict(wconv=wconv, bconv=bconv, g1w=g1w, g1sb=g1sb,
                bn1s=bn1s_row, bn1b=bn1b_row, g2w=g2w, g2b=g2b)


def prepare_graph(edge_index, num_nodes):
    """Dense adjacency with self loops + att2 gather indices (PyG edge order)."""
    src, dst = edge_index[0], edge_index[1]
    adj = jnp.zeros((num_nodes, num_nodes), jnp.float32).at[dst, src].set(1.0)
    diag = jnp.arange(num_nodes)
    adj = adj.at[diag, diag].set(1.0)                            # GATConv add_self_loops=True
    # PyG returns attention for original edges followed by appended self loops.
    dst_full = jnp.concatenate([dst, diag])
    src_full = jnp.concatenate([src, diag])
    return adj, dst_full, src_full


def temporal_gat_forward(x, adj, dst_idx, src_idx, prepped):
    N = x.shape[0]
    pack = max(128, ((N + OUT_DIM + 127) // 128) * 128)          # lane-dense output width
    vmem = pl.BlockSpec(memory_space=pltpu.MemorySpace.VMEM)
    inputs = (x, adj,
              prepped['wconv'], prepped['bconv'],
              prepped['g1w'], prepped['g1sb'],
              prepped['bn1s'], prepped['bn1b'],
              prepped['g2w'], prepped['g2b'])

    packed = pl.pallas_call(
        temporal_gat_kernel,
        out_shape=jax.ShapeDtypeStruct((N, pack), jnp.float32),
        in_specs=[vmem] * len(inputs),
        out_specs=vmem,
    )(*inputs)

    att2_dense = packed[:, :N]                                   # (N, N) dense attention
    out = packed[:, N:N + OUT_DIM]                               # (N, OUT_DIM) logits
    att2 = att2_dense[dst_idx, src_idx][:, None]                 # (E + N, 1), PyG order
    return out, att2


def init_params(key):
    ks = jax.random.split(key, 16)
    f32 = jnp.float32
    p = {
        'conv_w': 0.2 * jax.random.normal(ks[0], (CONV_OUT, NUM_FEATS, 3), f32),
        'conv_b': 0.1 * jax.random.normal(ks[1], (CONV_OUT,), f32),
        'bn0_g': 1.0 + 0.1 * jax.random.normal(ks[2], (FEAT0,), f32),
        'bn0_b': 0.1 * jax.random.normal(ks[3], (FEAT0,), f32),
        'bn0_m': 0.1 * jax.random.normal(ks[4], (FEAT0,), f32),
        'bn0_v': jax.random.uniform(ks[5], (FEAT0,), f32, 0.5, 1.5),
        'g1_w': 0.2 * jax.random.normal(ks[6], (FEAT0, GAT_HEADS * HID_DIM), f32),
        'g1_asrc': 0.2 * jax.random.normal(ks[7], (GAT_HEADS, HID_DIM), f32),
        'g1_adst': 0.2 * jax.random.normal(ks[8], (GAT_HEADS, HID_DIM), f32),
        'g1_b': 0.1 * jax.random.normal(ks[9], (GAT_HEADS * HID_DIM,), f32),
        'bn1_g': 1.0 + 0.1 * jax.random.normal(ks[10], (GAT_HEADS * HID_DIM,), f32),
        'bn1_b': 0.1 * jax.random.normal(ks[11], (GAT_HEADS * HID_DIM,), f32),
        'bn1_m': 0.1 * jax.random.normal(ks[12], (GAT_HEADS * HID_DIM,), f32),
        'bn1_v': jax.random.uniform(ks[13], (GAT_HEADS * HID_DIM,), f32, 0.5, 1.5),
        'g2_w': 0.2 * jax.random.normal(ks[14], (GAT_HEADS * HID_DIM, OUT_DIM), f32),
    }
    ks2 = jax.random.split(ks[15], 3)
    p['g2_asrc'] = 0.2 * jax.random.normal(ks2[0], (1, OUT_DIM), f32)
    p['g2_adst'] = 0.2 * jax.random.normal(ks2[1], (1, OUT_DIM), f32)
    p['g2_b'] = 0.1 * jax.random.normal(ks2[2], (OUT_DIM,), f32)
    return p


if __name__ == "__main__":
    key = jax.random.PRNGKey(0)
    k_x, k_p = jax.random.split(key)

    N = N_NODES
    x = jax.random.normal(k_x, (N, IN_DIM), jnp.float32)

    # deterministic graph: two outgoing edges per node (no self loops / dups)
    i = jnp.arange(N)
    src = jnp.concatenate([i, i])
    dst = jnp.concatenate([(i + 1) % N, (i + 3) % N])
    edge_index = jnp.stack([src, dst])                   # (2, E), E = 32

    params = init_params(k_p)

    # one-time precompute (hoisted off the per-call path)
    prepped = prepare_params(params)
    adj, dst_full, src_full = prepare_graph(edge_index, N)

    fwd = jax.jit(temporal_gat_forward)
    out, att2 = fwd(x, adj, dst_full, src_full, prepped)
    out = jax.block_until_ready(out)
    att2 = jax.block_until_ready(att2)

    assert out.shape == (N, OUT_DIM)
    assert att2.shape == (edge_index.shape[1] + N, 1)
    assert bool(jnp.all(jnp.isfinite(out))) and bool(jnp.all(jnp.isfinite(att2)))
    print("KERNEL_OK")
</pallas_src>

<mosaic_0001>
module attributes {stable_mosaic.version = 11 : i64} {
  func.func @temporal_gat_kernel(%arg0: memref<16x16xf32, #tpu.memory_space<vmem>>, %arg1: memref<16x16xf32, #tpu.memory_space<vmem>>, %arg2: memref<16x64xf32, #tpu.memory_space<vmem>>, %arg3: memref<1x64xf32, #tpu.memory_space<vmem>>, %arg4: memref<64x68xf32, #tpu.memory_space<vmem>>, %arg5: memref<1x68xf32, #tpu.memory_space<vmem>>, %arg6: memref<1x64xf32, #tpu.memory_space<vmem>>, %arg7: memref<1x64xf32, #tpu.memory_space<vmem>>, %arg8: memref<64x4xf32, #tpu.memory_space<vmem>>, %arg9: memref<1x2xf32, #tpu.memory_space<vmem>>, %arg10: memref<16x128xf32, #tpu.memory_space<vmem>>) attributes {dimension_semantics = [], scalar_prefetch = 0 : i64, scratch_operands = 0 : i64, tpu.core_type = #tpu.core_type<tc>} {
    %c0 = arith.constant 0 : index
    %c0_0 = arith.constant 0 : index
    %0 = vector.load %arg1[%c0, %c0_0] : memref<16x16xf32, #tpu.memory_space<vmem>>, vector<16x16xf32>
    %c0_1 = arith.constant 0 : index
    %c0_2 = arith.constant 0 : index
    %1 = vector.load %arg0[%c0_1, %c0_2] : memref<16x16xf32, #tpu.memory_space<vmem>>, vector<16x16xf32>
    %c0_3 = arith.constant 0 : index
    %c0_4 = arith.constant 0 : index
    %2 = vector.load %arg2[%c0_3, %c0_4] : memref<16x64xf32, #tpu.memory_space<vmem>>, vector<16x64xf32>
    %cst = arith.constant dense<0.000000e+00> : vector<16x64xf32>
    %3 = tpu.matmul %1, %2, %cst {dimension_numbers = #tpu.dot_dimension_numbers<[1], [0], [0], [1], [0, 0, 1, 1], [], []>} : vector<16x16xf32>, vector<16x64xf32>, vector<16x64xf32> -> vector<16x64xf32>
    %c0_5 = arith.constant 0 : index
    %c0_6 = arith.constant 0 : index
    %4 = vector.load %arg3[%c0_5, %c0_6] : memref<1x64xf32, #tpu.memory_space<vmem>>, vector<1x64xf32>
    %5 = vector.broadcast %4 : vector<1x64xf32> to vector<16x64xf32>
    %6 = arith.addf %3, %5 : vector<16x64xf32>
    %cst_7 = arith.constant 0.000000e+00 : f32
    %7 = vector.broadcast %cst_7 : f32 to vector<16x64xf32>
    %8 = arith.maximumf %6, %7 : vector<16x64xf32>
    %c0_8 = arith.constant 0 : index
    %c0_9 = arith.constant 0 : index
    %9 = vector.load %arg4[%c0_8, %c0_9] : memref<64x68xf32, #tpu.memory_space<vmem>>, vector<64x68xf32>
    %cst_10 = arith.constant dense<0.000000e+00> : vector<16x68xf32>
    %10 = tpu.matmul %8, %9, %cst_10 {dimension_numbers = #tpu.dot_dimension_numbers<[1], [0], [0], [1], [0, 0, 1, 1], [], []>} : vector<16x64xf32>, vector<64x68xf32>, vector<16x68xf32> -> vector<16x68xf32>
    %c0_11 = arith.constant 0 : index
    %c0_12 = arith.constant 0 : index
    %11 = vector.load %arg5[%c0_11, %c0_12] : memref<1x68xf32, #tpu.memory_space<vmem>>, vector<1x68xf32>
    %12 = vector.broadcast %11 : vector<1x68xf32> to vector<16x68xf32>
    %13 = arith.addf %10, %12 : vector<16x68xf32>
    %14 = vector.extract_strided_slice %13 {offsets = [0, 0], sizes = [16, 32], strides = [1, 1]} : vector<16x68xf32> to vector<16x32xf32>
    %15 = vector.extract_strided_slice %13 {offsets = [0, 64], sizes = [16, 1], strides = [1, 1]} : vector<16x68xf32> to vector<16x1xf32>
    %16 = vector.extract_strided_slice %13 {offsets = [0, 65], sizes = [16, 1], strides = [1, 1]} : vector<16x68xf32> to vector<16x1xf32>
    %cst_13 = arith.constant 1.000000e+00 : f32
    %17 = vector.broadcast %cst_13 : f32 to vector<16x1xf32>
    %cst_14 = arith.constant dense<0.000000e+00> : vector<16x16xf32>
    %18 = tpu.matmul %17, %15, %cst_14 {dimension_numbers = #tpu.dot_dimension_numbers<[1], [1], [0], [0], [0, 0, 1, 0], [], []>} : vector<16x1xf32>, vector<16x1xf32>, vector<16x16xf32> -> vector<16x16xf32>
    %19 = vector.broadcast %16 : vector<16x1xf32> to vector<16x16xf32>
    %20 = arith.addf %19, %18 : vector<16x16xf32>
    %cst_15 = arith.constant 0.000000e+00 : f32
    %21 = vector.broadcast %cst_15 : f32 to vector<16x16xf32>
    %22 = arith.cmpf ogt, %20, %21 : vector<16x16xf32>
    %cst_16 = arith.constant 2.000000e-01 : f32
    %23 = vector.broadcast %cst_16 : f32 to vector<16x16xf32>
    %24 = arith.mulf %23, %20 : vector<16x16xf32>
    %25 = arith.select %22, %20, %24 : vector<16x16xi1>, vector<16x16xf32>
    %cst_17 = arith.constant dense<0xFF800000> : vector<16xf32>
    %26 = vector.multi_reduction <maximumf>, %25, %cst_17 [1] : vector<16x16xf32> to vector<16xf32>
    %27 = vector.shape_cast %26 : vector<16xf32> to vector<16x1xf32>
    %28 = vector.broadcast %27 : vector<16x1xf32> to vector<16x16xf32>
    %29 = arith.subf %25, %28 : vector<16x16xf32>
    %30 = math.exp %29 : vector<16x16xf32>
    %31 = arith.mulf %30, %0 : vector<16x16xf32>
    %cst_18 = arith.constant dense<0.000000e+00> : vector<16xf32>
    %32 = vector.multi_reduction <add>, %31, %cst_18 [1] : vector<16x16xf32> to vector<16xf32>
    %33 = vector.shape_cast %32 : vector<16xf32> to vector<16x1xf32>
    %34 = tpu.reciprocal %33 {approx = true} : vector<16x1xf32> -> vector<16x1xf32>
    %35 = vector.broadcast %34 : vector<16x1xf32> to vector<16x16xf32>
    %36 = arith.mulf %31, %35 : vector<16x16xf32>
    %cst_19 = arith.constant dense<0.000000e+00> : vector<16x32xf32>
    %37 = tpu.matmul %36, %14, %cst_19 {dimension_numbers = #tpu.dot_dimension_numbers<[1], [0], [0], [1], [0, 0, 1, 1], [], []>} : vector<16x16xf32>, vector<16x32xf32>, vector<16x32xf32> -> vector<16x32xf32>
    %38 = vector.extract_strided_slice %13 {offsets = [0, 32], sizes = [16, 32], strides = [1, 1]} : vector<16x68xf32> to vector<16x32xf32>
    %39 = vector.extract_strided_slice %13 {offsets = [0, 66], sizes = [16, 1], strides = [1, 1]} : vector<16x68xf32> to vector<16x1xf32>
    %40 = vector.extract_strided_slice %13 {offsets = [0, 67], sizes = [16, 1], strides = [1, 1]} : vector<16x68xf32> to vector<16x1xf32>
    %cst_20 = arith.constant 1.000000e+00 : f32
    %41 = vector.broadcast %cst_20 : f32 to vector<16x1xf32>
    %cst_21 = arith.constant dense<0.000000e+00> : vector<16x16xf32>
    %42 = tpu.matmul %41, %39, %cst_21 {dimension_numbers = #tpu.dot_dimension_numbers<[1], [1], [0], [0], [0, 0, 1, 0], [], []>} : vector<16x1xf32>, vector<16x1xf32>, vector<16x16xf32> -> vector<16x16xf32>
    %43 = vector.broadcast %40 : vector<16x1xf32> to vector<16x16xf32>
    %44 = arith.addf %43, %42 : vector<16x16xf32>
    %cst_22 = arith.constant 0.000000e+00 : f32
    %45 = vector.broadcast %cst_22 : f32 to vector<16x16xf32>
    %46 = arith.cmpf ogt, %44, %45 : vector<16x16xf32>
    %cst_23 = arith.constant 2.000000e-01 : f32
    %47 = vector.broadcast %cst_23 : f32 to vector<16x16xf32>
    %48 = arith.mulf %47, %44 : vector<16x16xf32>
    %49 = arith.select %46, %44, %48 : vector<16x16xi1>, vector<16x16xf32>
    %cst_24 = arith.constant dense<0xFF800000> : vector<16xf32>
    %50 = vector.multi_reduction <maximumf>, %49, %cst_24 [1] : vector<16x16xf32> to vector<16xf32>
    %51 = vector.shape_cast %50 : vector<16xf32> to vector<16x1xf32>
    %52 = vector.broadcast %51 : vector<16x1xf32> to vector<16x16xf32>
    %53 = arith.subf %49, %52 : vector<16x16xf32>
    %54 = math.exp %53 : vector<16x16xf32>
    %55 = arith.mulf %54, %0 : vector<16x16xf32>
    %cst_25 = arith.constant dense<0.000000e+00> : vector<16xf32>
    %56 = vector.multi_reduction <add>, %55, %cst_25 [1] : vector<16x16xf32> to vector<16xf32>
    %57 = vector.shape_cast %56 : vector<16xf32> to vector<16x1xf32>
    %58 = tpu.reciprocal %57 {approx = true} : vector<16x1xf32> -> vector<16x1xf32>
    %59 = vector.broadcast %58 : vector<16x1xf32> to vector<16x16xf32>
    %60 = arith.mulf %55, %59 : vector<16x16xf32>
    %cst_26 = arith.constant dense<0.000000e+00> : vector<16x32xf32>
    %61 = tpu.matmul %60, %38, %cst_26 {dimension_numbers = #tpu.dot_dimension_numbers<[1], [0], [0], [1], [0, 0, 1, 1], [], []>} : vector<16x16xf32>, vector<16x32xf32>, vector<16x32xf32> -> vector<16x32xf32>
    %62 = tpu.concatenate %37, %61 in 1 : vector<16x32xf32>, vector<16x32xf32> -> vector<16x64xf32>
    %c0_27 = arith.constant 0 : index
    %c0_28 = arith.constant 0 : index
    %63 = vector.load %arg6[%c0_27, %c0_28] : memref<1x64xf32, #tpu.memory_space<vmem>>, vector<1x64xf32>
    %64 = vector.broadcast %63 : vector<1x64xf32> to vector<16x64xf32>
    %65 = arith.mulf %62, %64 : vector<16x64xf32>
    %c0_29 = arith.constant 0 : index
    %c0_30 = arith.constant 0 : index
    %66 = vector.load %arg7[%c0_29, %c0_30] : memref<1x64xf32, #tpu.memory_space<vmem>>, vector<1x64xf32>
    %67 = vector.broadcast %66 : vector<1x64xf32> to vector<16x64xf32>
    %68 = arith.addf %65, %67 : vector<16x64xf32>
    %cst_31 = arith.constant 0.000000e+00 : f32
    %69 = vector.broadcast %cst_31 : f32 to vector<16x64xf32>
    %70 = arith.cmpf ogt, %68, %69 : vector<16x64xf32>
    %cst_32 = arith.constant 0.000000e+00 : f32
    %71 = vector.broadcast %cst_32 : f32 to vector<16x64xf32>
    %72 = arith.minimumf %68, %71 : vector<16x64xf32>
    %73 = math.exp %72 : vector<16x64xf32>
    %cst_33 = arith.constant 1.000000e+00 : f32
    %74 = vector.broadcast %cst_33 : f32 to vector<16x64xf32>
    %75 = arith.subf %73, %74 : vector<16x64xf32>
    %76 = arith.select %70, %68, %75 : vector<16x64xi1>, vector<16x64xf32>
    %c0_34 = arith.constant 0 : index
    %c0_35 = arith.constant 0 : index
    %77 = vector.load %arg8[%c0_34, %c0_35] : memref<64x4xf32, #tpu.memory_space<vmem>>, vector<64x4xf32>
    %cst_36 = arith.constant dense<0.000000e+00> : vector<16x4xf32>
    %78 = tpu.matmul %76, %77, %cst_36 {dimension_numbers = #tpu.dot_dimension_numbers<[1], [0], [0], [1], [0, 0, 1, 1], [], []>} : vector<16x64xf32>, vector<64x4xf32>, vector<16x4xf32> -> vector<16x4xf32>
    %79 = vector.extract_strided_slice %78 {offsets = [0, 0], sizes = [16, 2], strides = [1, 1]} : vector<16x4xf32> to vector<16x2xf32>
    %80 = vector.extract_strided_slice %78 {offsets = [0, 2], sizes = [16, 1], strides = [1, 1]} : vector<16x4xf32> to vector<16x1xf32>
    %81 = vector.extract_strided_slice %78 {offsets = [0, 3], sizes = [16, 1], strides = [1, 1]} : vector<16x4xf32> to vector<16x1xf32>
    %cst_37 = arith.constant 1.000000e+00 : f32
    %82 = vector.broadcast %cst_37 : f32 to vector<16x1xf32>
    %cst_38 = arith.constant dense<0.000000e+00> : vector<16x16xf32>
    %83 = tpu.matmul %82, %80, %cst_38 {dimension_numbers = #tpu.dot_dimension_numbers<[1], [1], [0], [0], [0, 0, 1, 0], [], []>} : vector<16x1xf32>, vector<16x1xf32>, vector<16x16xf32> -> vector<16x16xf32>
    %84 = vector.broadcast %81 : vector<16x1xf32> to vector<16x16xf32>
    %85 = arith.addf %84, %83 : vector<16x16xf32>
    %cst_39 = arith.constant 0.000000e+00 : f32
    %86 = vector.broadcast %cst_39 : f32 to vector<16x16xf32>
    %87 = arith.cmpf ogt, %85, %86 : vector<16x16xf32>
    %cst_40 = arith.constant 2.000000e-01 : f32
    %88 = vector.broadcast %cst_40 : f32 to vector<16x16xf32>
    %89 = arith.mulf %88, %85 : vector<16x16xf32>
    %90 = arith.select %87, %85, %89 : vector<16x16xi1>, vector<16x16xf32>
    %cst_41 = arith.constant dense<0xFF800000> : vector<16xf32>
    %91 = vector.multi_reduction <maximumf>, %90, %cst_41 [1] : vector<16x16xf32> to vector<16xf32>
    %92 = vector.shape_cast %91 : vector<16xf32> to vector<16x1xf32>
    %93 = vector.broadcast %92 : vector<16x1xf32> to vector<16x16xf32>
    %94 = arith.subf %90, %93 : vector<16x16xf32>
    %95 = math.exp %94 : vector<16x16xf32>
    %96 = arith.mulf %95, %0 : vector<16x16xf32>
    %cst_42 = arith.constant dense<0.000000e+00> : vector<16xf32>
    %97 = vector.multi_reduction <add>, %96, %cst_42 [1] : vector<16x16xf32> to vector<16xf32>
    %98 = vector.shape_cast %97 : vector<16xf32> to vector<16x1xf32>
    %99 = tpu.reciprocal %98 {approx = true} : vector<16x1xf32> -> vector<16x1xf32>
    %100 = vector.broadcast %99 : vector<16x1xf32> to vector<16x16xf32>
    %101 = arith.mulf %96, %100 : vector<16x16xf32>
    %cst_43 = arith.constant dense<0.000000e+00> : vector<16x2xf32>
    %102 = tpu.matmul %101, %79, %cst_43 {dimension_numbers = #tpu.dot_dimension_numbers<[1], [0], [0], [1], [0, 0, 1, 1], [], []>} : vector<16x16xf32>, vector<16x2xf32>, vector<16x2xf32> -> vector<16x2xf32>
    %c0_44 = arith.constant 0 : index
    %c0_45 = arith.constant 0 : index
    %103 = vector.load %arg9[%c0_44, %c0_45] : memref<1x2xf32, #tpu.memory_space<vmem>>, vector<1x2xf32>
    %104 = vector.broadcast %103 : vector<1x2xf32> to vector<16x2xf32>
    %105 = arith.addf %102, %104 : vector<16x2xf32>
    %cst_46 = arith.constant 0.000000e+00 : f32
    %106 = vector.broadcast %cst_46 : f32 to vector<16x110xf32>
    %107 = tpu.concatenate %101, %105, %106 in 1 : vector<16x16xf32>, vector<16x2xf32>, vector<16x110xf32> -> vector<16x128xf32>
    %c0_47 = arith.constant 0 : index
    %c0_48 = arith.constant 0 : index
    %108 = vector.load %arg10[%c0_47, %c0_48] : memref<16x128xf32, #tpu.memory_space<vmem>>, vector<16x128xf32>
    tpu.vector_store %arg10[%c0_47, %c0_48], %107 {strides = array<i32>} : memref<16x128xf32, #tpu.memory_space<vmem>>, vector<16x128xf32>,
    return
  }
}

</mosaic_0001>

<bundles_post_ra>
// kernel: temporal_gat_forward.1
= control target key start
LH: loop header
LB: loop body
LE: loop exit
PB: predicated region body
PF: predicated region fallthrough
CT: control target
= control target key end

     0   :  { %15 = vsyncpa [#allocation3], 0  ;;  %s1710_s0 = inlined_call_operand.hbm [shape: f32[16,16], index: 0, kind: input, shape index: {}]   ;;  %s1711_s1 = inlined_call_operand.vmem [shape: f32[16,16], index: 1, kind: input, shape index: {}]   ;;  %s1712_s2 = inlined_call_operand.hbm [shape: f32[16,64], index: 2, kind: input, shape index: {}]   ;;  %s1713_s3 = inlined_call_operand.hbm [shape: f32[1,64], index: 3, kind: input, shape index: {}]   ;;  %s1714_s4 = inlined_call_operand.vmem [shape: f32[64,68], index: 4, kind: input, shape index: {}]   ;;  %s1715_s5 = inlined_call_operand.hbm [shape: f32[1,68], index: 5, kind: input, shape index: {}]   ;;  %s1716_s6 = inlined_call_operand.hbm [shape: f32[1,64], index: 6, kind: input, shape index: {}]   ;;  %s1717_s7 = inlined_call_operand.hbm [shape: f32[1,64], index: 7, kind: input, shape index: {}]   ;;  %s1718_s8 = inlined_call_operand.vmem [shape: f32[64,4], index: 8, kind: input, shape index: {}]   ;;  %s1719_s9 = inlined_call_operand.hbm [shape: f32[1,2], index: 9, kind: input, shape index: {}]   ;;  %s1720_s10 = inlined_call_operand.vmem [shape: f32[16,128], index: 10, kind: output, shape index: {}]  }
   0x1   :  { %16 = vsyncpa [#allocation5], 0 }
   0x2   :  { %17 = vsyncpa [#allocation8], 0 }
   0x3   :  { %18 = vsyncpa [#allocation11], 0  ;;  %s1465_s13 = smov [#allocation4]   ;;  %s1466_s15 = smov [#allocation7]  }
   0x4   :  { %s38_s14 = sshll.u32 %s1465_s13, 4  ;;  %s63_s16 = sshll.u32 %s1466_s15, 4  ;;  %s39_s14 = int_to_ptr.vmem [resolvable:$true] %s38_s14  ;;  %s64_s16 = int_to_ptr.vmem [resolvable:$true] %s63_s16 }
   0x5   :  { %s1325_s17 = scalar_lea.vmem %s39_s14, 256  ;;  %p1330_p1 = scmp.lt.s32.totalorder %s39_s14, %s39_s14 }
   0x6   :  { %p1326_p0 = scmp.ne.s32.totalorder %s39_s14, %s1325_s17  ;;  %p1331_p2 = scmp.lt.s32.totalorder %s1325_s17, %s1325_s17 }
   0x8   :  { %p1332_p3 = por %p1331_p2, %p1330_p1 }
   0xa   :  { %p1333_p4 = pnand %p1332_p3, %p1326_p0 }
   0xc   :  { %1336 = shalt.err (!%p1333_p4)
}
   0xd   :  { %s1467_s18 = smov 128   ;;  %s1468_s19 = smov 8  }
   0xe   :  { %44 = dma.hbm_to_vmem [thread:$0]  %s1712_s2, 256, %s39_s14, [#allocation5], %s1467_s18, %s1467_s18, %s1468_s19  }
   0xf   :  { %s1345_s22 = scalar_lea.vmem %s64_s16, 16  ;;  %s1349_s23 = scalar_lea.vmem %s64_s16, 32 }
  0x10   :  { %p1346_p5 = scmp.ne.s32.totalorder %s64_s16, %s1345_s22  ;;  %p1350_p6 = scmp.lt.s32.totalorder %s64_s16, %s64_s16 }
  0x11   :  { %p1351_p7 = scmp.lt.s32.totalorder %s1349_s23, %s1345_s22 }
  0x13   :  { %p1352_p8 = por %p1351_p7, %p1350_p6 }
  0x15   :  { %p1353_p9 = pnand %p1352_p8, %p1346_p5 }
  0x17   :  { %1356 = shalt.err (!%p1353_p9)
}
  0x18   :  { %66 = dma.hbm_to_vmem [thread:$0]  %s1715_s5, 16, %s64_s16, [#allocation8]  }
  0x19   :  { %s1469_s26 = smov [#allocation10]   ;;  %s1470_s28 = smov [#allocation2]  }
  0x1a   :  { %s83_s27 = sshll.u32 %s1469_s26, 4  ;;  %s24_s29 = sshll.u32 %s1470_s28, 4  ;;  %s84_s27 = int_to_ptr.vmem [resolvable:$true] %s83_s27  ;;  %s25_s29 = int_to_ptr.vmem [resolvable:$true] %s24_s29 }
  0x1b   :  { %s1365_s30 = scalar_lea.vmem %s84_s27, 16  ;;  %s1369_s2 = scalar_lea.vmem %s84_s27, 32 }
  0x1c   :  { %p1366_p10 = scmp.ne.s32.totalorder %s84_s27, %s1365_s30  ;;  %p1370_p11 = scmp.lt.s32.totalorder %s84_s27, %s84_s27 }
  0x1d   :  { %p1371_p12 = scmp.lt.s32.totalorder %s1369_s2, %s1365_s30 }
  0x1f   :  { %p1372_p13 = por %p1371_p12, %p1370_p11 }
  0x21   :  { %p1373_p0 = pnand %p1372_p13, %p1366_p10 }
  0x23   :  { %1376 = shalt.err (!%p1373_p0)
}
  0x24   :  { %86 = dma.hbm_to_vmem [thread:$0]  %s1717_s7, 16, %s84_s27, [#allocation11]  }
  0x25   :  { %s1385_s13 = scalar_lea.vmem %s25_s29, 256  ;;  %p1390_p2 = scmp.lt.s32.totalorder %s25_s29, %s25_s29 }
  0x26   :  { %p1386_p1 = scmp.ne.s32.totalorder %s25_s29, %s1385_s13  ;;  %p1391_p3 = scmp.lt.s32.totalorder %s1385_s13, %s1385_s13 }
  0x28   :  { %p1392_p4 = por %p1391_p3, %p1390_p2 }
  0x2a   :  { %p1393_p5 = pnand %p1392_p4, %p1386_p1 }
  0x2c   :  { %1396 = shalt.err (!%p1393_p5)
}
  0x2d   :  { %30 = dma.hbm_to_vmem [thread:$0]  %s1710_s0, 256, %s25_s29, [#allocation3], %s1467_s18, %s1467_s18, %s1468_s19  }
  0x2e   :  { %s1471_s15 = smov [#allocation6]   ;;  %s1472_s17 = smov [#allocation9]  }
  0x2f   :  { %s51_s16 = sshll.u32 %s1471_s15, 4  ;;  %s73_s20 = sshll.u32 %s1472_s17, 4  ;;  %s52_s16 = int_to_ptr.vmem [resolvable:$true] %s51_s16  ;;  %s74_s20 = int_to_ptr.vmem [resolvable:$true] %s73_s20 }
  0x30   :  { %s1405_s7 = scalar_lea.vmem %s52_s16, 16  ;;  %s1409_s21 = scalar_lea.vmem %s52_s16, 32 }
  0x31   :  { %p1406_p6 = scmp.ne.s32.totalorder %s52_s16, %s1405_s7  ;;  %p1410_p7 = scmp.lt.s32.totalorder %s52_s16, %s52_s16 }
  0x32   :  { %p1411_p8 = scmp.lt.s32.totalorder %s1409_s21, %s1405_s7 }
  0x34   :  { %p1412_p9 = por %p1411_p8, %p1410_p7 }
  0x36   :  { %p1413_p10 = pnand %p1412_p9, %p1406_p6 }
  0x38   :  { %1416 = shalt.err (!%p1413_p10)
}
  0x39   :  { %54 = dma.hbm_to_vmem [thread:$0]  %s1713_s3, 16, %s52_s16, [#allocation5]  }
  0x3a   :  { %s1425_s24 = scalar_lea.vmem %s74_s20, 16  ;;  %s1429_s0 = scalar_lea.vmem %s74_s20, 32 }
  0x3b   :  { %p1426_p11 = scmp.ne.s32.totalorder %s74_s20, %s1425_s24  ;;  %p1430_p12 = scmp.lt.s32.totalorder %s74_s20, %s74_s20 }
  0x3c   :  { %p1431_p13 = scmp.lt.s32.totalorder %s1429_s0, %s1425_s24 }
  0x3e   :  { %p1432_p0 = por %p1431_p13, %p1430_p12 }
  0x40   :  { %p1433_p1 = pnand %p1432_p0, %p1426_p11 }
  0x42   :  { %1436 = shalt.err (!%p1433_p1)
}
  0x43   :  { %76 = dma.hbm_to_vmem [thread:$0]  %s1716_s6, 16, %s74_s20, [#allocation8]  }
  0x44   :  { %s1473_s25 = smov [#allocation12]  }
  0x45   :  { %s95_s26 = sshll.u32 %s1473_s25, 4  ;;  %s96_s26 = int_to_ptr.vmem [resolvable:$true] %s95_s26 }
  0x46   :  { %s1445_s27 = scalar_lea.vmem %s96_s26, 16  ;;  %s1449_s28 = scalar_lea.vmem %s96_s26, 32 }
  0x47   :  { %p1446_p2 = scmp.ne.s32.totalorder %s96_s26, %s1445_s27  ;;  %p1450_p3 = scmp.lt.s32.totalorder %s96_s26, %s96_s26 }
  0x48   :  { %p1451_p4 = scmp.lt.s32.totalorder %s1449_s28, %s1445_s27 }
  0x4a   :  { %p1452_p5 = por %p1451_p4, %p1450_p3 }
  0x4c   :  { %p1453_p6 = pnand %p1452_p5, %p1446_p2 }
  0x4e   :  { %1456 = shalt.err (!%p1453_p6)
}
  0x4f   :  { %98 = dma.hbm_to_vmem [thread:$0]  %s1719_s9, 16, %s96_s26, [#allocation11]  }
  0x50   :  { %1457 = dma.done.wait [#allocation3], 256  }
  0x51   :  { %1458 = vsyncadd [#allocation3], 4294967040 }
  0x52   :  { %1459 = dma.done.wait [#allocation5], 272  }
  0x53   :  { %1460 = vsyncadd [#allocation5], 4294967024 }
  0x54   :  { %1461 = dma.done.wait [#allocation8], 32  }
  0x55   :  { %1462 = vsyncadd [#allocation8], 4294967264 }
  0x56   :  { %1463 = dma.done.wait [#allocation11], 32  }
  0x57   :  { %1464 = vsyncadd [#allocation11], 4294967264  ;;  %vm133_vm0 = vcmask 130048   ;;  %v125_v0 = vld [vmem:[#allocation4 + $0x8] sm:$0xff]  ;;  %v124_v1 = vld [vmem:[#allocation4] sm:$0xff]  ;;  %vm232_vm1 = vcmask 523264  }
  0x58   :  { %v122_v2 = vld [vmem:[#allocation2] sm:$0xff]  ;;  %1179 = vmatprep.subr.mxu0 %v125_v0  ;;  %v224_v3 = vld [vmem:[%s1714_s4 + $0x38] sm:$0xff]  ;;  %v223_v4 = vld [vmem:[%s1714_s4 + $0x30] sm:$0xff]  ;;  %v1474_v19 = vmov 65   ;;  %vm320_vm2 = vcmask 7168   ;;  %v1475_v20 = vmov 1.0  }
  0x59   :  { %1183 = vmatprep.mubr.msk.f32.mxu0 %vm133_vm0, %v122_v2  ;;  %1180 = vmatpush3.msra.mxu0 %v125_v0  ;;  %v123_v5 = vld [vmem:[#allocation2 + $0x8] sm:$0xff]  ;;  %v221_v7 = vld [vmem:[%s1714_s4 + $0x20] sm:$0xff]  ;;  %v220_v8 = vld [vmem:[%s1714_s4 + $0x18] sm:$0xff]  ;;  %v1477_v28 = vmov 67   ;;  %s1478_s23 = smov 62   ;;  %s1480_s25 = smov 32  }
  0x5a   :  { %1186 = vmatprep.subr.mxu1 %v224_v3  ;;  %1181 = vmatprep.subr.mxu0 %v124_v1  ;;  %v222_v6 = vld [vmem:[%s1714_s4 + $0x28] sm:$0xff]  ;;  %v219_v9 = vld [vmem:[%s1714_s4 + $0x10] sm:$0xff]  ;;  %v217_v11 = vld [vmem:[%s1714_s4] sm:$0xff]  ;;  %vm742_vm7 = vcmask 261120   ;;  %s1483_s17 = smov 16   ;;  %vm1087_vm12 = vcmask 146432  }
  0x5b   :  { %1187 = vmatpush3.msra.mxu1 %v224_v3  ;;  %1182 = vmatpush3.msra.mxu0 %v124_v1  ;;  %v218_v10 = vld [vmem:[%s1714_s4 + $0x8] sm:$0xff]  ;;  %v1100_v12 = vld [vmem:[#allocation6] ss:$0 sm:$0xff]  ;;  %v1103_v21 = vld [vmem:[#allocation7] ss:$0 sm:$0xff]  ;;  %s1476_s4 = smov 64  }
  0x5c   :  { %1188 = vmatprep.subr.mxu1 %v223_v4  ;;  %1184 = vmatmul.mubr.msk.f32.vlgmr.msra.gmra.mxu0 %vm133_vm0, %v123_v5  ;;  %v1623_v48 = vld [vmem:[%s1711_s1] sm:$0xff]  ;;  %v1628_v51 = vld [vmem:[%s1711_s1 + $0x8] sm:$0xff]  ;;  %s1479_s1 = smov 96  }
  0x5d   :  { %1189 = vmatpush3.msra.mxu1 %v223_v4  ;;  %1285 = vset.pattern.permute.xlu1 %v1474_v19 }
  0x5e   :  { %1190 = vmatprep.subr.mxu1 %v222_v6  ;;  %1209 = vmatprep.mubr.msk.f32.mxu0 %vm320_vm2, %v1475_v20 }
  0x5f   :  { %1191 = vmatpush3.msra.mxu1 %v222_v6 }
  0x60   :  { %1192 = vmatprep.subr.mxu1 %v221_v7 }
  0x61   :  { %1193 = vmatpush3.msra.mxu1 %v221_v7 }
  0x62   :  { %1194 = vmatprep.subr.mxu1 %v220_v8 }
  0x63   :  { %1195 = vmatpush3.msra.mxu1 %v220_v8 }
  0x64   :  { %1196 = vmatprep.subr.mxu1 %v219_v9 }
  0x65   :  { %1197 = vmatpush3.msra.mxu1 %v219_v9 }
  0x66   :  { %1198 = vmatprep.subr.mxu1 %v218_v10 }
  0x67   :  { %1199 = vmatpush3.msra.mxu1 %v218_v10 }
  0x68   :  { %1200 = vmatprep.subr.mxu1 %v217_v11 }
  0x69   :  { %1201 = vmatpush3.msra.mxu1 %v217_v11 }
 0x11c   :  { %v1185_v13 = vpop.f32.mrf.mxu0 }
 0x11d   :  { %v212_v14 = vadd.f32 %v1185_v13, %v1100_v12 }
 0x11e   :  { %v206_v15 = vpop.f32.mrf.mxu0 }
 0x11f   :  { %v207_v16 = vadd.f32 %v1100_v12, %v206_v15  ;;  %v216_v18 = vmax.f32 %v212_v14, 0.0 }
 0x121   :  { %v215_v17 = vmax.f32 %v207_v16, 0.0 }
 0x123   :  { %1202 = vmatprep.mubr.msk.f32.mxu1 %vm232_vm1, %v215_v17 }
 0x124   :  { %1203 = vmatmul.mubr.msk.f32.vlgmr.msra.gmra.mxu1 %vm232_vm1, %v216_v18 }
 0x1e4   :  { %v1204_v22 = vpop.f32.mrf.mxu1 }
 0x1e5   :  { %v1596_v23 = vadd.f32 %v1204_v22, %v1103_v21 }
 0x1e6   :  { %v305_v24 = vpop.f32.mrf.mxu1 }
 0x1e7   :  { %v1598_v25 = vadd.f32 %v1103_v21, %v305_v24  ;;  %318 = vrot.lane.b32.xlu0 %v1596_v23, %s1476_s4 }
 0x1e9   :  { %404 = vperm.xlu1 %1285, %v1598_v25  }
 0x1eb   :  { %316 = vrot.lane.b32.xlu0 %v1598_v25, %s1476_s4 }
 0x1ed   :  { %408 = vperm.xlu1 %1285, %v1596_v23  }
 0x1f1   :  { %1286 = vset.pattern.permute.xlu1 %v1477_v28 }
 0x259   :  { %v319_v26 = vpop.permute.xlu0 %318 }
 0x25a   :  { %1205 = vmatprep.subr.msk.mxu0 %vm320_vm2, %v319_v26 }
 0x25b   :  { %1206 = vmatpush3.xpose.msk.msra.mxu0 %vm320_vm2, %v319_v26 }
 0x25d   :  { %v317_v27 = vpop.permute.xlu0 %316 }
 0x25e   :  { %1207 = vmatprep.subr.msk.mxu0 %vm320_vm2, %v317_v27 }
 0x25f   :  { %1208 = vmatpush3.xpose.msk.msra.mxu0 %vm320_vm2, %v317_v27 }
 0x260   :  { %1212 = vmatprep.subr.mxu0 %v1596_v23 }
 0x262   :  { %1210 = vmatmul.mubr.msk.f32.vlgmr.msra.gmra.mxu0 %vm320_vm2, %v1475_v20 }
 0x263   :  { %1213 = vmatpush3.msra.mxu0 %v1596_v23 }
 0x264   :  { %1214 = vmatprep.subr.mxu0 %v1598_v25  ;;  %v405_v29 = vpop.permute.xlu1 %404 }
 0x265   :  { %1215 = vmatpush3.msra.mxu0 %v1598_v25 }
 0x268   :  { %v409_v30 = vpop.permute.xlu1 %408 }
 0x322   :  { %v1211_v31 = vpop.f32.mrf.mxu0 }
 0x323   :  { %v412_v32 = vadd.f32 %v1211_v31, %v409_v30 }
 0x324   :  { %v394_v33 = vpop.f32.mrf.mxu0 }
 0x325   :  { %v416_v34 = vmul.f32 0.2, %v412_v32  ;;  %v411_v35 = vadd.f32 %v405_v29, %v394_v33  ;;  %vm414_vm3 = vcmp.gt.f32.partialorder %v412_v32, 0.0 }
 0x327   :  { %v415_v36 = vmul.f32 0.2, %v411_v35  ;;  %v418_v37 = vsel %vm414_vm3, %v412_v32, %v416_v34  ;;  %vm413_vm4 = vcmp.gt.f32.partialorder %v411_v35, 0.0 }
 0x328   :  { %v422_v38 = vsel %vm133_vm0, %v418_v37, -inf }
 0x329   :  { %423 = vmax.xlane.f32.xlu1 %v422_v38  ;;  %v417_v39 = vsel %vm413_vm4, %v411_v35, %v415_v36  ;;  %v780_v38 = vld [vmem:[%s1718_s8 + $0x28] sm:$0xff] }
 0x32a   :  { %v419_v40 = vsel %vm133_vm0, %v417_v39, -inf }
 0x32b   :  { %420 = vmax.xlane.f32.xlu0 %v419_v40  ;;  %v778_v40 = vld [vmem:[%s1718_s8 + $0x18] sm:$0xff] }
 0x33a   :  { %526 = vrot.lane.b32.xlu1 %v1596_v23, %s1478_s23 }
 0x33e   :  { %608 = vperm.xlu1 %1286, %v1598_v25  }
 0x342   :  { %612 = vperm.xlu1 %1286, %v1596_v23  }
 0x3b2   :  { %v424_v41 = vpop.xlane.xlu1 %423 }
 0x3b3   :  { %v426_v42 = vsub.f32 %v418_v37, %v424_v41  ;;  %v781_v37 = vld [vmem:[%s1718_s8 + $0x30] sm:$0xff] }
 0x3b4   :  { %v421_v43 = vpop.xlane.xlu0 %420  ;;  %v777_v41 = vld [vmem:[%s1718_s8 + $0x10] sm:$0xff] }
 0x3b5   :  { %v429_v44 = vmul.f32 1.442695, %v426_v42  ;;  %v425_v45 = vsub.f32 %v417_v39, %v421_v43  ;;  %v779_v39 = vld [vmem:[%s1718_s8 + $0x20] sm:$0xff]  ;;  %v776_v42 = vld [vmem:[%s1718_s8 + $0x8] sm:$0xff] }
 0x3b6   :  { %v527_v46 = vpop.permute.xlu1 %526  ;;  %v775_v43 = vld [vmem:[%s1718_s8] sm:$0xff] }
 0x3b7   :  { %v427_v47 = vmul.f32 1.442695, %v425_v45  ;;  %1219 = vmatprep.subr.msk.mxu0 %vm320_vm2, %v527_v46  ;;  %1289 = vpow2.f32 %v429_v44  ;;  %v1118_v44 = vld [vmem:[#allocation9] ss:$0 sm:$0xff] }
 0x3b9   :  { %1291 = vpow2.f32 %v427_v47 }
 0x3ba   :  { %v609_v63 = vpop.permute.xlu1 %608 }
 0x3be   :  { %v613_v2 = vpop.permute.xlu1 %612 }
 0x3c4   :  { %v1290_v49 = vpop.eup %1289 }
 0x3c5   :  { %v432_v54 = vmul.f32 %v1290_v49, %v1628_v51 }
 0x3c6   :  { %v1292_v50 = vpop.eup %1291 }
 0x3c7   :  { %v431_v52 = vmul.f32 %v1292_v50, %v1623_v48  ;;  %v436_v55 = vsel %vm133_vm0, %v432_v54, 0.0 }
 0x3c9   :  { %v433_v53 = vsel %vm133_vm0, %v431_v52, 0.0 }
 0x3ca   :  { %434 = vadd.xlane.f32.xlu0 %v433_v53 }
 0x3ce   :  { %437 = vadd.xlane.f32.xlu0 %v436_v55 }
 0x3e4   :  { %524 = vrot.lane.b32.xlu0 %v1598_v25, %s1478_s23 }
 0x453   :  { %v435_v56 = vpop.xlane.xlu0 %434 }
 0x454   :  { %1293 = vrcp.f32 %v435_v56 }
 0x457   :  { %v438_v57 = vpop.xlane.xlu0 %437 }
 0x458   :  { %1295 = vrcp.f32 %v438_v57 }
 0x45b   :  { %v525_v62 = vpop.permute.xlu0 %524 }
 0x461   :  { %v1294_v58 = vpop.eup %1293 }
 0x462   :  { %v441_v59 = vmul.f32 %v1294_v58, %v431_v52 }
 0x464   :  { %1216 = vmatprep.mubr.msk.f32.mxu0 %vm133_vm0, %v441_v59 }
 0x465   :  { %v1296_v60 = vpop.eup %1295 }
 0x466   :  { %v442_v61 = vmul.f32 %v1296_v60, %v432_v54 }
 0x468   :  { %1217 = vmatmul.mubr.msk.f32.vlgmr.msra.gmra.mxu0 %vm133_vm0, %v442_v61 }
 0x469   :  { %1220 = vmatpush3.xpose.msk.msra.mxu0 %vm320_vm2, %v527_v46  ;;  %1223 = vmatprep.mubr.msk.f32.mxu0 %vm320_vm2, %v1475_v20  ;;  %v1119_v46 = vld [vmem:[#allocation10] ss:$0 sm:$0xff] }
 0x46a   :  { %1221 = vmatprep.subr.msk.mxu0 %vm320_vm2, %v525_v62 }
 0x46d   :  { %1222 = vmatpush3.xpose.msk.msra.mxu0 %vm320_vm2, %v525_v62 }
 0x470   :  { %1224 = vmatmul.mubr.msk.f32.vlgmr.msra.gmra.mxu0 %vm320_vm2, %v1475_v20 }
 0x471   :  { %1256 = vmatprep.mubr.msk.f32.mxu0 %vm320_vm2, %v1475_v20 }
 0x528   :  { %v1646_v0 = vpop.f32.mrf.mxu0 }
 0x52a   :  { %v1648_v1 = vpop.f32.mrf.mxu0 }
 0x530   :  { %v1225_v3 = vpop.f32.mrf.mxu0 }
 0x531   :  { %v616_v4 = vadd.f32 %v1225_v3, %v613_v2 }
 0x532   :  { %v598_v5 = vpop.f32.mrf.mxu0 }
 0x533   :  { %v620_v6 = vmul.f32 0.2, %v616_v4  ;;  %v615_v7 = vadd.f32 %v609_v63, %v598_v5  ;;  %vm618_vm5 = vcmp.gt.f32.partialorder %v616_v4, 0.0 }
 0x535   :  { %v619_v8 = vmul.f32 0.2, %v615_v7  ;;  %v622_v9 = vsel %vm618_vm5, %v616_v4, %v620_v6  ;;  %vm617_vm6 = vcmp.gt.f32.partialorder %v615_v7, 0.0 }
 0x536   :  { %v626_v10 = vsel %vm133_vm0, %v622_v9, -inf }
 0x537   :  { %627 = vmax.xlane.f32.xlu1 %v626_v10  ;;  %v621_v11 = vsel %vm617_vm6, %v615_v7, %v619_v8 }
 0x538   :  { %v623_v12 = vsel %vm133_vm0, %v621_v11, -inf }
 0x539   :  { %624 = vmax.xlane.f32.xlu0 %v623_v12 }
 0x548   :  { %649 = vrot.lane.b32.xlu1 %v1596_v23, %s1479_s1 }
 0x5c0   :  { %v628_v13 = vpop.xlane.xlu1 %627 }
 0x5c1   :  { %v630_v14 = vsub.f32 %v622_v9, %v628_v13 }
 0x5c2   :  { %v625_v15 = vpop.xlane.xlu0 %624 }
 0x5c3   :  { %v633_v16 = vmul.f32 1.442695, %v630_v14  ;;  %v629_v17 = vsub.f32 %v621_v11, %v625_v15 }
 0x5c4   :  { %v650_v18 = vpop.permute.xlu1 %649 }
 0x5c5   :  { %1297 = vpow2.f32 %v633_v16  ;;  %v631_v19 = vmul.f32 1.442695, %v629_v17  ;;  %1226 = vmatprep.subr.mxu1 %v650_v18 }
 0x5c6   :  { %1227 = vmatpush3.msra.mxu1 %v650_v18 }
 0x5c7   :  { %1299 = vpow2.f32 %v631_v19 }
 0x5d2   :  { %v1298_v21 = vpop.eup %1297 }
 0x5d3   :  { %v636_v22 = vmul.f32 %v1298_v21, %v1628_v51 }
 0x5d4   :  { %v1300_v24 = vpop.eup %1299 }
 0x5d5   :  { %v640_v26 = vsel %vm133_vm0, %v636_v22, 0.0  ;;  %v635_v27 = vmul.f32 %v1300_v24, %v1623_v48 }
 0x5d6   :  { %641 = vadd.xlane.f32.xlu0 %v640_v26 }
 0x5d7   :  { %v637_v23 = vsel %vm133_vm0, %v635_v27, 0.0 }
 0x5da   :  { %638 = vadd.xlane.f32.xlu0 %v637_v23 }
 0x5f0   :  { %647 = vrot.lane.b32.xlu0 %v1598_v25, %s1479_s1  ;;  %v782_v25 = vld [vmem:[%s1718_s8 + $0x38] sm:$0xff]  ;;  %s1482_s8 = smov 126  }
 0x65f   :  { %v642_v28 = vpop.xlane.xlu0 %641 }
 0x660   :  { %1301 = vrcp.f32 %v642_v28 }
 0x663   :  { %v639_v29 = vpop.xlane.xlu0 %638 }
 0x664   :  { %1303 = vrcp.f32 %v639_v29 }
 0x667   :  { %v648_v30 = vpop.permute.xlu0 %647 }
 0x668   :  { %1228 = vmatprep.subr.mxu1 %v648_v30 }
 0x669   :  { %1229 = vmatpush3.msra.mxu1 %v648_v30 }
 0x66a   :  { %1233 = vmatprep.subr.mxu1 %v782_v25 }
 0x66d   :  { %v1302_v31 = vpop.eup %1301 }
 0x66e   :  { %v646_v34 = vmul.f32 %v1302_v31, %v636_v22 }
 0x671   :  { %v1304_v32 = vpop.eup %1303 }
 0x672   :  { %v645_v33 = vmul.f32 %v1304_v32, %v635_v27 }
 0x674   :  { %1230 = vmatprep.mubr.msk.f32.mxu1 %vm133_vm0, %v645_v33 }
 0x675   :  { %1231 = vmatmul.mubr.msk.f32.vlgmr.msra.gmra.mxu1 %vm133_vm0, %v646_v34 }
 0x676   :  { %1234 = vmatpush3.msra.mxu1 %v782_v25 }
 0x677   :  { %1235 = vmatprep.subr.mxu1 %v781_v37 }
 0x678   :  { %1236 = vmatpush3.msra.mxu1 %v781_v37 }
 0x679   :  { %1237 = vmatprep.subr.mxu1 %v780_v38 }
 0x67a   :  { %1238 = vmatpush3.msra.mxu1 %v780_v38 }
 0x67b   :  { %1239 = vmatprep.subr.mxu1 %v779_v39 }
 0x67c   :  { %1240 = vmatpush3.msra.mxu1 %v779_v39 }
 0x67d   :  { %1241 = vmatprep.subr.mxu1 %v778_v40 }
 0x67e   :  { %1242 = vmatpush3.msra.mxu1 %v778_v40 }
 0x67f   :  { %1243 = vmatprep.subr.mxu1 %v777_v41 }
 0x680   :  { %1244 = vmatpush3.msra.mxu1 %v777_v41 }
 0x681   :  { %1245 = vmatprep.subr.mxu1 %v776_v42 }
 0x682   :  { %1246 = vmatpush3.msra.mxu1 %v776_v42 }
 0x683   :  { %1247 = vmatprep.subr.mxu1 %v775_v43 }
 0x684   :  { %1248 = vmatpush3.msra.mxu1 %v775_v43 }
 0x735   :  { %v1232_v35 = vpop.f32.mrf.mxu1 }
 0x737   :  { %v725_v36 = vpop.f32.mrf.mxu1 }
 0x738   :  { %736 = vrot.lane.b32.xlu1 %v725_v36, %s1480_s25 }
 0x73c   :  { %738 = vrot.lane.b32.xlu1 %v1232_v35, %s1480_s25 }
 0x7aa   :  { %v737_v45 = vpop.permute.xlu1 %736 }
 0x7ab   :  { %v743_v47 = vsel %vm742_vm7, %v1648_v1, %v737_v45 }
 0x7ac   :  { %v752_v49 = vmul.f32 %v1118_v44, %v743_v47 }
 0x7ae   :  { %v761_v50 = vadd.f32 %v1119_v46, %v752_v49  ;;  %v739_v52 = vpop.permute.xlu1 %738 }
 0x7af   :  { %v744_v53 = vsel %vm742_vm7, %v1646_v0, %v739_v52  ;;  %v1481_v0 = vmov 3  }
 0x7b0   :  { %v765_v54 = vmin.f32 %v761_v50, 0.0  ;;  %v753_v55 = vmul.f32 %v1118_v44, %v744_v53  ;;  %vm763_vm8 = vcmp.gt.f32.partialorder %v761_v50, 0.0  ;;  %1287 = vset.pattern.permute.xlu0 %v1481_v0  ;;  %1288 = vset.pattern.permute.xlu1 %v1481_v0 }
 0x7b2   :  { %v767_v56 = vmul.f32 1.442695, %v765_v54  ;;  %v762_v57 = vadd.f32 %v1119_v46, %v753_v55 }
 0x7b4   :  { %1305 = vpow2.f32 %v767_v56  ;;  %v766_v58 = vmin.f32 %v762_v57, 0.0  ;;  %vm764_vm9 = vcmp.gt.f32.partialorder %v762_v57, 0.0 }
 0x7b6   :  { %v769_v59 = vmul.f32 1.442695, %v766_v58 }
 0x7b8   :  { %1307 = vpow2.f32 %v769_v59 }
 0x7c1   :  { %v1306_v60 = vpop.eup %1305 }
 0x7c2   :  { %v1120_v61 = vadd.f32 -1.0, %v1306_v60 }
 0x7c4   :  { %v773_v62 = vsel %vm763_vm8, %v761_v50, %v1120_v61 }
 0x7c5   :  { %v1308_v63 = vpop.eup %1307  ;;  %1249 = vmatprep.mubr.msk.f32.mxu1 %vm232_vm1, %v773_v62 }
 0x7c6   :  { %v1121_v1 = vadd.f32 -1.0, %v1308_v63 }
 0x7c8   :  { %v774_v2 = vsel %vm764_vm9, %v762_v57, %v1121_v1 }
 0x7c9   :  { %1250 = vmatmul.mubr.msk.f32.vlgmr.msra.gmra.mxu1 %vm232_vm1, %v774_v2 }
 0x889   :  { %v1251_v3 = vpop.f32.mrf.mxu1 }
 0x88a   :  { %868 = vrot.lane.b32.xlu0 %v1251_v3, %s1482_s8 }
 0x88b   :  { %v855_v4 = vpop.f32.mrf.mxu1 }
 0x88c   :  { %866 = vrot.lane.b32.xlu1 %v855_v4, %s1482_s8 }
 0x88e   :  { %950 = vperm.xlu0 %1287, %v855_v4  }
 0x890   :  { %954 = vperm.xlu1 %1288, %v1251_v3  }
 0x8fc   :  { %v869_v5 = vpop.permute.xlu0 %868 }
 0x8fd   :  { %1252 = vmatprep.subr.msk.mxu0 %vm320_vm2, %v869_v5 }
 0x8fe   :  { %1253 = vmatpush3.xpose.msk.msra.mxu0 %vm320_vm2, %v869_v5  ;;  %v867_v6 = vpop.permute.xlu1 %866 }
 0x8ff   :  { %1254 = vmatprep.subr.msk.mxu0 %vm320_vm2, %v867_v6 }
 0x902   :  { %1255 = vmatpush3.xpose.msk.msra.mxu0 %vm320_vm2, %v867_v6 }
 0x903   :  { %1259 = vmatprep.subr.mxu0 %v1251_v3 }
 0x905   :  { %1257 = vmatmul.mubr.msk.f32.vlgmr.msra.gmra.mxu0 %vm320_vm2, %v1475_v20 }
 0x906   :  { %1260 = vmatpush3.msra.mxu0 %v1251_v3 }
 0x907   :  { %1261 = vmatprep.subr.mxu0 %v855_v4 }
 0x908   :  { %1262 = vmatpush3.msra.mxu0 %v855_v4 }
 0x909   :  { %v951_v10 = vpop.permute.xlu0 %950 }
 0x90b   :  { %v955_v7 = vpop.permute.xlu1 %954 }
 0x9c5   :  { %v1258_v8 = vpop.f32.mrf.mxu0 }
 0x9c6   :  { %v958_v9 = vadd.f32 %v1258_v8, %v955_v7 }
 0x9c7   :  { %v940_v11 = vpop.f32.mrf.mxu0 }
 0x9c8   :  { %v962_v12 = vmul.f32 0.2, %v958_v9  ;;  %v957_v13 = vadd.f32 %v951_v10, %v940_v11  ;;  %vm960_vm10 = vcmp.gt.f32.partialorder %v958_v9, 0.0 }
 0x9ca   :  { %v961_v14 = vmul.f32 0.2, %v957_v13  ;;  %v964_v15 = vsel %vm960_vm10, %v958_v9, %v962_v12  ;;  %vm959_vm11 = vcmp.gt.f32.partialorder %v957_v13, 0.0 }
 0x9cb   :  { %v968_v16 = vsel %vm133_vm0, %v964_v15, -inf }
 0x9cc   :  { %969 = vmax.xlane.f32.xlu0 %v968_v16  ;;  %v963_v17 = vsel %vm959_vm11, %v957_v13, %v961_v14 }
 0x9cd   :  { %v965_v20 = vsel %vm133_vm0, %v963_v17, -inf }
 0x9ce   :  { %966 = vmax.xlane.f32.xlu1 %v965_v20 }
 0xa55   :  { %v970_v18 = vpop.xlane.xlu0 %969 }
 0xa56   :  { %v972_v19 = vsub.f32 %v964_v15, %v970_v18 }
 0xa57   :  { %v967_v21 = vpop.xlane.xlu1 %966 }
 0xa58   :  { %v975_v22 = vmul.f32 1.442695, %v972_v19  ;;  %v971_v24 = vsub.f32 %v963_v17, %v967_v21 }
 0xa5a   :  { %1309 = vpow2.f32 %v975_v22  ;;  %v973_v26 = vmul.f32 1.442695, %v971_v24 }
 0xa5c   :  { %1311 = vpow2.f32 %v973_v26 }
 0xa67   :  { %v1310_v27 = vpop.eup %1309 }
 0xa68   :  { %v978_v23 = vmul.f32 %v1310_v27, %v1628_v51  ;;  %v1128_v51 = vld [vmem:[#allocation12] ss:$0 sm:$0xff] }
 0xa69   :  { %v1312_v28 = vpop.eup %1311 }
 0xa6a   :  { %v982_v29 = vsel %vm133_vm0, %v978_v23, 0.0  ;;  %v977_v30 = vmul.f32 %v1312_v28, %v1623_v48 }
 0xa6b   :  { %983 = vadd.xlane.f32.xlu1 %v982_v29 }
 0xa6c   :  { %v979_v31 = vsel %vm133_vm0, %v977_v30, 0.0 }
 0xa6d   :  { %980 = vadd.xlane.f32.xlu0 %v979_v31 }
 0xaf4   :  { %v984_v32 = vpop.xlane.xlu1 %983 }
 0xaf5   :  { %1313 = vrcp.f32 %v984_v32 }
 0xaf6   :  { %v981_v33 = vpop.xlane.xlu0 %980 }
 0xaf7   :  { %1315 = vrcp.f32 %v981_v33 }
 0xb02   :  { %v1314_v34 = vpop.eup %1313 }
 0xb03   :  { %v988_v25 = vmul.f32 %v1314_v34, %v978_v23 }
 0xb04   :  { %v1316_v35 = vpop.eup %1315 }
 0xb05   :  { %v987_v36 = vmul.f32 %v1316_v35, %v977_v30 }
 0xb07   :  { %1263 = vmatprep.mubr.msk.f32.mxu0 %vm133_vm0, %v987_v36 }
 0xb08   :  { %1264 = vmatmul.mubr.msk.f32.vlgmr.msra.gmra.mxu0 %vm133_vm0, %v988_v25 }
 0xbc8   :  { %v1265_v37 = vpop.f32.mrf.mxu0 }
 0xbc9   :  { %v1074_v38 = vadd.f32 %v1265_v37, %v1128_v51 }
 0xbca   :  { %v1068_v48 = vpop.f32.mrf.mxu0 }
 0xbcb   :  { %v1069_v39 = vadd.f32 %v1128_v51, %v1068_v48  ;;  %1081 = vrot.lane.b32.xlu1 %v1074_v38, %s1483_s17 }
 0xbcd   :  { %1079 = vrot.lane.b32.xlu0 %v1069_v39, %s1483_s17 }
 0xc3d   :  { %v1082_v40 = vpop.permute.xlu1 %1081 }
 0xc3e   :  { %v1086_v41 = vsel %vm133_vm0, %v988_v25, %v1082_v40 }
 0xc3f   :  { %v1089_v42 = vsel %vm1087_vm12, %v1086_v41, 0.0  ;;  %v1080_v43 = vpop.permute.xlu0 %1079 }
 0xc40   :  { %1091 = vst [vmem:[%s1720_s10 + $0x8] sm:$0xff] %v1089_v42  ;;  %v1085_v44 = vsel %vm133_vm0, %v987_v36, %v1080_v43 }
 0xc41   :  { %v1088_v45 = vsel %vm1087_vm12, %v1085_v44, 0.0 }
 0xc42   :  { %1090 = vst [vmem:[%s1720_s10] sm:$0xff] %v1088_v45 }
 0xc43   :  { %1096 = vsyncpa [#allocation3], 1 }
 0xc44   :  { %1097 = vsyncpa [#allocation5], 1 }
 0xc45   :  { %1098 = vsyncpa [#allocation8], 1 }
 0xc46   :  { %1099 = vsyncpa [#allocation11], 1 }

</bundles_post_ra>
